<compile_context>
chip_gen: v7x
topology: tpu7x:2x2x1
jax: 0.10.0
libtpu: 0.0.40
codegen_flags: <defaults>
</compile_context>

<pallas_src>
import functools
import math

import jax
import jax.numpy as jnp
from jax.experimental import pallas as pl
from jax.experimental.pallas import tpu as pltpu


def _condition_gate_kernel(q_ref, x_ref, y_ref, mask_ref, w_ref, o_ref):
    h = w_ref.shape[1]

    q = q_ref[...]
    x = x_ref[...]
    y = y_ref[...]

    # Gate logits: cat([x*q, y*q], -1) @ W.T decomposed into two MXU dots with
    # f32 accumulation.  Operands are fed in the weight's dtype (a bf16-packed
    # weight => single-pass MXU even for f32 activations).
    qx = x * q
    qy = y * q
    if qx.dtype != w_ref.dtype:
        qx = qx.astype(w_ref.dtype)
        qy = qy.astype(w_ref.dtype)
    logits = jnp.dot(qx, w_ref[0:h, :], preferred_element_type=jnp.float32)
    logits = logits + jnp.dot(qy, w_ref[h:2 * h, :],
                              preferred_element_type=jnp.float32)

    # Sigmoid (EUP) and mask; mask arrives as f32, (block_m, 1) or (block_m, H).
    # (v5e-only micro-opt of exp + pl.reciprocal(approx=True) is skipped to
    # keep exact-match tolerance with the reference.)
    gate = jax.nn.sigmoid(logits) * mask_ref[...]

    # Blend: out = y + gate * (x - y).
    if o_ref.dtype == jnp.float32:
        o_ref[...] = y + gate * (x - y)
    else:
        # Low-precision blend: bf16-native VALU on v6e/v7x (Mosaic upcasts
        # transparently on v5e); matches PyTorch low-precision semantics.
        g = gate.astype(o_ref.dtype)
        o_ref[...] = (y + g * (x - y)).astype(o_ref.dtype)


def _vmem_limit_default():
    try:
        kind = jax.devices()[0].device_kind.lower()
    except Exception:
        kind = ""
    # v5e / v6e have 128 MiB VMEM per core -> be generous; v7x only has 64 MiB
    # (and unknown parts are treated conservatively).
    if "v5" in kind or "v6" in kind:
        return 96 * 1024 * 1024
    return 48 * 1024 * 1024


def _tile_rows(m, h, mask_lane, in_dtype, w_dtype, block_m=None):
    """Pick (block_m, vmem_limit_bytes) from shapes, dtypes and device VMEM."""
    in_item = jnp.dtype(in_dtype).itemsize
    w_item = jnp.dtype(w_dtype).itemsize
    sub = 8 * max(1, 4 // in_item)                 # sublane multiple: 8 f32, 16 bf16
    limit = _vmem_limit_default()
    w_bytes = 2 * (2 * h * h * w_item)             # (2H, H) weight, double-buffered
    row_bytes = 4 * h * in_item + 4 * mask_lane    # q, x, y, out (+ f32 mask) per row

    if block_m is None:
        if m <= sub:
            block_m = m
        else:
            avail = (limit - 8 * 1024 * 1024) - w_bytes
            if avail < 2 * row_bytes * sub:
                # Weight alone dominates the VMEM budget (very large H).
                # TODO(synk): add an output-column grid axis so the (2H, H)
                # weight is tiled across N instead of held whole in VMEM.
                avail = 2 * row_bytes * sub
            block_m = avail // (2 * row_bytes)     # input/output streams are double-buffered
            if m >= 2 * sub:
                # >=2 grid steps: both v7x TensorCores get rows and the
                # pipeline has something to overlap.
                block_m = min(block_m, pl.cdiv(m, 2))

    if m <= sub:
        block_m = m                                 # single full-extent block
    else:
        block_m = max(sub, min((int(block_m) // sub) * sub, (m // sub) * sub, 2048))

    limit = max(limit, w_bytes + 2 * row_bytes * min(block_m, m) + 8 * 1024 * 1024)
    return int(block_m), int(limit)


def prepare_gate_weight(weight, matmul_dtype=None):
    """One-time repack of the nn.Linear(2H, H, bias=False) weight.

    `weight` is in PyTorch layout (H, 2H).  Returns the (2H, H) layout the
    kernel consumes, so cat([qx, qy], -1) @ weight.T == qx @ w[:H] + qy @ w[H:].
    Call once at parameter-init time (it is an HBM copy) -- not per step.
    Pass matmul_dtype=jnp.bfloat16 to halve the weight footprint and run the
    MXU single-pass (precision loss ahead of a sigmoid is negligible).
    """
    w = jnp.asarray(weight).T
    if matmul_dtype is not None:
        w = w.astype(matmul_dtype)
    return w


@functools.partial(jax.jit, static_argnames=("block_m",))
def condition_gate(q, x, y, gate_mask, w_cat, block_m=None):
    """q, x, y: (..., H); gate_mask broadcastable to (..., H); w_cat: (2H, H).

    `w_cat` comes from prepare_gate_weight(weight) where `weight` is the
    PyTorch-layout (H, 2H) Linear weight.
    """
    h = q.shape[-1]
    if w_cat.shape != (2 * h, h):
        raise ValueError(
            f"w_cat must have shape {(2 * h, h)}, got {w_cat.shape}; "
            "use prepare_gate_weight() on the (H, 2H) PyTorch weight.")
    lead = q.shape[:-1]
    m = math.prod(lead) if lead else 1

    # Mask: stream a narrow f32 (M, 1) column when it broadcasts over H.
    mask_lane = h if (gate_mask.ndim >= 1 and gate_mask.shape[-1] == h and h > 1) else 1
    mask2 = jnp.broadcast_to(gate_mask, lead + (mask_lane,)).astype(jnp.float32)
    mask2 = mask2.reshape(m, mask_lane)

    q2 = q.reshape(m, h)
    x2 = x.reshape(m, h)
    y2 = y.reshape(m, h)

    block_m, vmem_limit = _tile_rows(m, h, mask_lane, q.dtype, w_cat.dtype, block_m)
    grid = (pl.cdiv(m, block_m),)    # ragged last block is clipped by Mosaic; no padding

    row_spec = pl.BlockSpec((block_m, h), lambda i: (i, 0))
    mask_spec = pl.BlockSpec((block_m, mask_lane), lambda i: (i, 0))
    # Grid-invariant weight: fetched once by the pipeline, stays resident.
    # TODO(synk): single-buffer it via pipeline_mode=pl.Buffered(1) once that
    # path is verified on the deployed jax version (frees 2H*H*itemsize of
    # VMEM on v7x for larger row tiles).
    w_spec = pl.BlockSpec((2 * h, h), lambda i: (0, 0))

    out2 = pl.pallas_call(
        _condition_gate_kernel,
        out_shape=jax.ShapeDtypeStruct((m, h), q.dtype),
        grid=grid,
        in_specs=[row_spec, row_spec, row_spec, mask_spec, w_spec],
        out_specs=row_spec,
        compiler_params=pltpu.CompilerParams(
            dimension_semantics=("parallel",),   # rows shard across v7x's 2 TCs
            vmem_limit_bytes=int(vmem_limit),
        ),
    )(q2, x2, y2, mask2, w_cat)

    return out2.reshape(*lead, h)


def _reference(q, x, y, gate_mask, weight):
    qx = x * q
    qy = y * q
    cat = jnp.concatenate([qx, qy], axis=-1)
    gate_val = jax.nn.sigmoid(cat @ weight.T) * gate_mask
    return gate_val * x + (1.0 - gate_val) * y


if __name__ == "__main__":
    batch, seq, h_dim = 2, 8, 32
    key = jax.random.PRNGKey(0)
    kq, kx, ky, km, kw = jax.random.split(key, 5)

    q = jax.random.normal(kq, (batch, seq, h_dim), dtype=jnp.float32)
    x = jax.random.normal(kx, (batch, seq, h_dim), dtype=jnp.float32)
    y = jax.random.normal(ky, (batch, seq, h_dim), dtype=jnp.float32)
    # 0/1 mask broadcast over the hidden dim (typical usage of the module).
    gate_mask = (jax.random.uniform(km, (batch, seq, 1)) > 0.3).astype(jnp.float32)

    # Deterministic Linear(2H -> H, bias=False) weight, kaiming-uniform-like.
    bound = 1.0 / (2 * h_dim) ** 0.5
    weight = jax.random.uniform(kw, (h_dim, 2 * h_dim), dtype=jnp.float32,
                                minval=-bound, maxval=bound)

    # One-time weight repack, outside the jitted hot path (perf-review item).
    w_cat = prepare_gate_weight(weight)

    out = jax.block_until_ready(condition_gate(q, x, y, gate_mask, w_cat))
    ref = _reference(q, x, y, gate_mask, weight)
    assert out.shape == (batch, seq, h_dim)
    assert jnp.allclose(out, ref, atol=1e-5, rtol=1e-5), "mismatch vs reference"

    # Ragged-tail path: M = 14 rows -> 8-row tiles, clipped last block (no pad,
    # no output slice).
    q_t, x_t, y_t, m_t = q[:, :7], x[:, :7], y[:, :7], gate_mask[:, :7]
    out_t = jax.block_until_ready(condition_gate(q_t, x_t, y_t, m_t, w_cat))
    ref_t = _reference(q_t, x_t, y_t, m_t, weight)
    assert jnp.allclose(out_t, ref_t, atol=1e-5, rtol=1e-5), "tail mismatch"

    print("KERNEL_OK")
</pallas_src>

<mosaic_0001>
module attributes {stable_mosaic.version = 11 : i64} {
  func.func @_condition_gate_kernel(%arg0: i32, %arg1: memref<8x32xf32, #tpu.memory_space<vmem>>, %arg2: memref<8x32xf32, #tpu.memory_space<vmem>>, %arg3: memref<8x32xf32, #tpu.memory_space<vmem>>, %arg4: memref<8x1xf32, #tpu.memory_space<vmem>>, %arg5: memref<64x32xf32, #tpu.memory_space<vmem>>, %arg6: memref<8x32xf32, #tpu.memory_space<vmem>>) attributes {dimension_semantics = [#tpu.dimension_semantics<parallel>], iteration_bounds = array<i64: 2>, scalar_prefetch = 0 : i64, scratch_operands = 0 : i64, tpu.core_type = #tpu.core_type<tc>, window_params = [{transform_indices = @transform_0, window_bounds = array<i64: 8, 32>}, {transform_indices = @transform_1, window_bounds = array<i64: 8, 32>}, {transform_indices = @transform_2, window_bounds = array<i64: 8, 32>}, {transform_indices = @transform_3, window_bounds = array<i64: 8, 1>}, {pipeline_mode = #tpu.pipeline_mode<synchronous>, transform_indices = @transform_4, window_bounds = array<i64: 64, 32>}, {transform_indices = @transform_5, window_bounds = array<i64: 8, 32>}]} {
    %c0 = arith.constant 0 : index
    %c0_0 = arith.constant 0 : index
    %0 = vector.load %arg1[%c0, %c0_0] : memref<8x32xf32, #tpu.memory_space<vmem>>, vector<8x32xf32>
    %c0_1 = arith.constant 0 : index
    %c0_2 = arith.constant 0 : index
    %1 = vector.load %arg2[%c0_1, %c0_2] : memref<8x32xf32, #tpu.memory_space<vmem>>, vector<8x32xf32>
    %c0_3 = arith.constant 0 : index
    %c0_4 = arith.constant 0 : index
    %2 = vector.load %arg3[%c0_3, %c0_4] : memref<8x32xf32, #tpu.memory_space<vmem>>, vector<8x32xf32>
    %3 = arith.mulf %1, %0 : vector<8x32xf32>
    %4 = arith.mulf %2, %0 : vector<8x32xf32>
    %c0_5 = arith.constant 0 : index
    %c0_6 = arith.constant 0 : index
    %5 = vector.load %arg5[%c0_5, %c0_6] : memref<64x32xf32, #tpu.memory_space<vmem>>, vector<32x32xf32>
    %cst = arith.constant dense<0.000000e+00> : vector<8x32xf32>
    %6 = tpu.matmul %3, %5, %cst {dimension_numbers = #tpu.dot_dimension_numbers<[1], [0], [0], [1], [0, 0, 1, 1], [], []>} : vector<8x32xf32>, vector<32x32xf32>, vector<8x32xf32> -> vector<8x32xf32>
    %c32 = arith.constant 32 : index
    %c0_7 = arith.constant 0 : index
    %7 = vector.load %arg5[%c32, %c0_7] : memref<64x32xf32, #tpu.memory_space<vmem>>, vector<32x32xf32>
    %cst_8 = arith.constant dense<0.000000e+00> : vector<8x32xf32>
    %8 = tpu.matmul %4, %7, %cst_8 {dimension_numbers = #tpu.dot_dimension_numbers<[1], [0], [0], [1], [0, 0, 1, 1], [], []>} : vector<8x32xf32>, vector<32x32xf32>, vector<8x32xf32> -> vector<8x32xf32>
    %9 = arith.addf %6, %8 : vector<8x32xf32>
    %10 = arith.negf %9 : vector<8x32xf32>
    %11 = math.exp %10 : vector<8x32xf32>
    %cst_9 = arith.constant 1.000000e+00 : f32
    %12 = vector.broadcast %cst_9 : f32 to vector<8x32xf32>
    %13 = arith.addf %12, %11 : vector<8x32xf32>
    %14 = arith.divf %12, %13 : vector<8x32xf32>
    %c0_10 = arith.constant 0 : index
    %c0_11 = arith.constant 0 : index
    %15 = vector.load %arg4[%c0_10, %c0_11] : memref<8x1xf32, #tpu.memory_space<vmem>>, vector<8x1xf32>
    %16 = vector.broadcast %15 : vector<8x1xf32> to vector<8x32xf32>
    %17 = arith.mulf %14, %16 : vector<8x32xf32>
    %18 = arith.subf %1, %2 : vector<8x32xf32>
    %19 = arith.mulf %17, %18 : vector<8x32xf32>
    %20 = arith.addf %2, %19 : vector<8x32xf32>
    %c0_12 = arith.constant 0 : index
    %c0_13 = arith.constant 0 : index
    %21 = vector.load %arg6[%c0_12, %c0_13] : memref<8x32xf32, #tpu.memory_space<vmem>>, vector<8x32xf32>
    tpu.vector_store %arg6[%c0_12, %c0_13], %20 {strides = array<i32>} : memref<8x32xf32, #tpu.memory_space<vmem>>, vector<8x32xf32>,
    return
  }
  func.func @transform_0(%arg0: i32) -> (i32, i32) {
    %c0_i32 = arith.constant 0 : i32
    %c0_i32_0 = arith.constant 0 : i32
    return %arg0, %c0_i32 : i32, i32
  }
  func.func @transform_1(%arg0: i32) -> (i32, i32) {
    %c0_i32 = arith.constant 0 : i32
    %c0_i32_0 = arith.constant 0 : i32
    return %arg0, %c0_i32 : i32, i32
  }
  func.func @transform_2(%arg0: i32) -> (i32, i32) {
    %c0_i32 = arith.constant 0 : i32
    %c0_i32_0 = arith.constant 0 : i32
    return %arg0, %c0_i32 : i32, i32
  }
  func.func @transform_3(%arg0: i32) -> (i32, i32) {
    %c0_i32 = arith.constant 0 : i32
    %c0_i32_0 = arith.constant 0 : i32
    return %arg0, %c0_i32 : i32, i32
  }
  func.func @transform_4(%arg0: i32) -> (i32, i32) {
    %c0_i32 = arith.constant 0 : i32
    %c0_i32_0 = arith.constant 0 : i32
    %c0_i32_1 = arith.constant 0 : i32
    return %c0_i32, %c0_i32_0 : i32, i32
  }
  func.func @transform_5(%arg0: i32) -> (i32, i32) {
    %c0_i32 = arith.constant 0 : i32
    %c0_i32_0 = arith.constant 0 : i32
    return %arg0, %c0_i32 : i32, i32
  }
}

</mosaic_0001>

<bundles_post_ra>
// kernel: condition_gate.1
= control target key start
LH: loop header
LB: loop body
LE: loop exit
PB: predicated region body
PF: predicated region fallthrough
CT: control target
= control target key end

     0   :  { %10 = vsyncpa [#allocation3], 0  ;;  %s901_s0 = inlined_call_operand.vmem [shape: f32[16,32], index: 0, kind: input, shape index: {}]   ;;  %s902_s1 = inlined_call_operand.vmem [shape: f32[16,32], index: 1, kind: input, shape index: {}]   ;;  %s903_s2 = inlined_call_operand.vmem [shape: f32[16,32], index: 2, kind: input, shape index: {}]   ;;  %s904_s3 = inlined_call_operand.vmem [shape: f32[16,1], index: 3, kind: input, shape index: {}]   ;;  %s905_s4 = inlined_call_operand.vmem [shape: f32[64,32], index: 4, kind: input, shape index: {}]   ;;  %s906_s5 = inlined_call_operand.hbm [shape: f32[16,32], index: 5, kind: output, shape index: {}]  }
   0x1   :  { %12 = vsyncpa [#allocation3 + $0x1], 0  ;;  %s765_s18 = smov 0   ;;  %s767_s19 = smov 0  }
   0x2   :  { %s769_s20 = smov 0   ;;  %s771_s21 = smov 0  }
   0x3 LB: > { %s786_s22 = sadd.s32 4294967295, %s728_s21   ;;  %s557_s23 = sadd.s32 4294967294, %s728_s21   ;;  %s728_s21 = sphi %s771_s21, %s912_s21   ;;  %s724_s20 = sphi %s769_s20, %s911_s20   ;;  %s720_s19 = sphi %s767_s19, %s910_s19   ;;  %s716_s18 = sphi %s765_s18, %s909_s18  }
   0x4   : > { %s790_s24 = sadd.s32 1, %s728_s21   ;;  %s150_s25 = sadd.s32 1, %s724_s20 }
   0x5   : > { %s147_s26 = ssub.s32 %s728_s21, %s790_s24  ;;  %p160_p0 = scmp.ne.s32.totalorder %s724_s20, %s720_s19 }
   0x6   : > { %p148_p1 = scmp.eq.s32.totalorder %s147_s26, 0  ;;  %p161_p2 = scmp.eq.s32.totalorder %s786_s22, 1 }
   0x7   : > { %p166_p3 = scmp.ne.s32.totalorder %s720_s19, %s716_s18  ;;  %p167_p4 = scmp.eq.s32.totalorder %s557_s23, 1 }
   0x8   : > { %s801_s27 = scalar_select %p148_p1, %s724_s20, %s150_s25  }
   0x9   : > { %p803_p5 = por %p161_p2, %p160_p0  ;;  %p807_p6 = por %p167_p4, %p166_p3 }
   0xa   : > { %p560_p7 = scmp.ge.s32.totalorder %s728_s21, 1  ;;  %p216_p8 = scmp.lt.s32.totalorder %s728_s21, 3 }
   0xc   : > { %p217_p9 = pnand %p560_p7, %p216_p8 }
   0xd   : > { %v280_v0 = vld [vmem:[%s905_s4 + $0x20] sm:$0xff] (!%p217_p9)  ;;  %v281_v1 = vld [vmem:[%s905_s4 + $0x28] sm:$0xff] (!%p217_p9)  ;;  %v730_v3 = vmov (!%p217_p9), 0.0|0.0   ;;  %v282_v6 = vld [vmem:[%s905_s4 + $0x30] sm:$0xff] (!%p217_p9)  ;;  %p255_p10 = scmp.lt.s32.totalorder (!%p217_p9), %s786_s22, 1  ;;  %vm731_vm0 = vmmov (!%p217_p9), 0  }
   0xe   : > { %220 = sbr.rel (%p217_p9) target bundleno = 290 (0x122), region = 40  ;;  %v276_v2 = vld [vmem:[%s905_s4] sm:$0xff] (!%p217_p9)  ;;  %605 = vmatprep.subr.bf16.mxu1 (!%p217_p9), %v730_v3  ;;  %611 = vmatprep.subr.bf16.mxu0 (!%p217_p9), %v730_v3  ;;  %v606_v4 = vpack.c.bf16 (!%p217_p9), %v281_v1, %v280_v0  ;;  %v277_v5 = vld [vmem:[%s905_s4 + $0x8] sm:$0xff] (!%p217_p9)  ;;  %v283_v7 = vld [vmem:[%s905_s4 + $0x38] sm:$0xff] (!%p217_p9)  ;;  %v732_v11 = vmov (!%p217_p9), 0.0   ;;  %v733_v13 = vmov (!%p217_p9), 0  }
   0xf   : > { %v612_v8 = vpack.c.bf16 (!%p217_p9), %v277_v5, %v276_v2  ;;  %v278_v9 = vld [vmem:[%s905_s4 + $0x10] sm:$0xff] (!%p217_p9)  ;;  %v279_v10 = vld [vmem:[%s905_s4 + $0x18] sm:$0xff] (!%p217_p9)  ;;  %591 = vmatprep.mubr.msk.f32.mxu1 (!%p217_p9), %vm731_vm0, %v732_v11  ;;  %602 = vmatprep.mubr.msk.f32.mxu0 (!%p217_p9), %vm731_vm0, %v732_v11  ;;  %v609_v12 = vpack.c.bf16 (!%p217_p9), %v283_v7, %v282_v6  ;;  %vm284_vm1 = vcmask (!%p217_p9), 261120   ;;  %s252_s25 = sand.u32 (!%p217_p9), 1, %s720_s19  }
  0x10   : > { %607 = vmatpush3.bf16.msra.mxu1 (!%p217_p9), %v606_v4  ;;  %661 = vset.pattern.permute.xlu0 (!%p217_p9), %v733_v13  ;;  %v615_v14 = vpack.c.bf16 (!%p217_p9), %v279_v10, %v278_v9  ;;  %s561_s26 = sshll.u32 (!%p217_p9), %s252_s25, 3  ;;  %s449_s11 = scalar_lea.sflag (!%p217_p9), [#allocation3], %s252_s25 }
  0x11   : > { %613 = vmatpush3.bf16.msra.mxu0 (!%p217_p9), %v612_v8  ;;  %608 = vmatprep.subr.bf16.mxu1 (!%p217_p9), %v730_v3 }
  0x12   : > { %614 = vmatprep.subr.bf16.mxu0 (!%p217_p9), %v730_v3 }
  0x14   : > { %610 = vmatpush3.bf16.msra.mxu1 (!%p217_p9), %v609_v12 }
  0x15   : > { %s256_s30 = scalar_select %p255_p10, %s786_s22, 1  ;;  %616 = vmatpush3.bf16.msra.mxu0 %v615_v14 }
  0x17   : > { %s562_s6 = sshll.u32 %s256_s30, 3  ;;  %s570_s30 = sshll.u32 %s786_s22, 7 }
  0x18   : > { %s258_s9 = scalar_lea.vmem %s901_s0, %s562_s6  ;;  %s266_s12 = scalar_lea.vmem %s903_s2, %s562_s6 }
  0x19   : > { %v271_v15 = vld [vmem:[%s258_s9] sm:$0xff]  ;;  %s262_s15 = scalar_lea.vmem %s902_s1, %s562_s6  ;;  %s270_s23 = scalar_lea.vmem %s904_s3, %s562_s6 }
  0x1a   : > { %v273_v16 = vld [vmem:[%s266_s12] sm:$0xff]  ;;  %s254_s6 = scalar_lea.vmem [#allocation2], %s561_s26  ;;  %s858_s10 = scalar_lea.hbm %s906_s5, %s570_s30 }
  0x1b   : > { %v275_v17 = vmul.f32 %v273_v16, %v271_v15  ;;  %v272_v18 = vld [vmem:[%s262_s15] sm:$0xff]  ;;  %s462_s7 = sshll.u32 %s254_s6, 4  ;;  %s734_s22 = smov [#allocation2]   ;;  %s860_s7 = int_to_ptr.vmem [resolvable:$true] %s462_s7 }
  0x1c   : > { %v437_v19 = vld [vmem:[%s270_s23] sm:$0xff]  ;;  %v274_v20 = vmul.f32 %v272_v18, %v271_v15  ;;  %v444_v30 = vsub.f32 %v272_v18, %v273_v16  ;;  %s666_s12 = scalar_lea.vmem %s860_s7, 128  ;;  %s670_s13 = sshll.u32 %s734_s22, 4  ;;  %s671_s13 = int_to_ptr.vmem [resolvable:$false] %s670_s13 }
  0x1d   : > { %440 = vperm.xlu0 %661, %v437_v19   ;;  %592 = vmatmul.mubr.msk.f32.vlgmr.msra.gmra.mrb[0].mxu1 %vm284_vm1, %v275_v17  ;;  %p667_p11 = scmp.ne.s32.totalorder %s860_s7, %s666_s12  ;;  %s672_s14 = scalar_lea.vmem %s671_s13, 256 }
  0x1e   : > { %603 = vmatmul.mubr.msk.f32.vlgmr.msra.gmra.mrb[0].mxu0 %vm284_vm1, %v274_v20  ;;  %p673_p0 = scmp.lt.s32.totalorder %s860_s7, %s671_s13  ;;  %p674_p1 = scmp.lt.s32.totalorder %s672_s14, %s666_s12 }
  0x1f   : > { %p668_p12 = pnand %p667_p11, %p803_p5 }
  0x20   : > { %p675_p2 = por %p674_p1, %p673_p0 }
  0x21   : > { %p669_p13 = pneg %p668_p12 }
  0x23   : > { %p676_p3 = pnand %p675_p2, %p669_p13 }
  0x9c   : > { %v441_v29 = vpop.permute.xlu0 %440 }
  0xf0   : > { %v354_v21 = vpop.f32.mrb[0].mxu1 }
  0xf1   : > { %v427_v22 = vpop.f32.mrb[0].mxu0  ;;  %v593_v23 = vpop.f32.mrb[1].mxu1 }
  0xf2   : > { %v428_v24 = vadd.f32 %v427_v22, %v354_v21  ;;  %v604_v25 = vpop.f32.mrb[1].mxu0 }
  0xf4   : > { %v568_v26 = vmul.f32 -1.442695, %v428_v24 }
  0xf6   : > { %662 = vpow2.f32 %v568_v26 }
 0x100   : > { %v663_v27 = vpop.eup %662 }
 0x101   : > { %v434_v28 = vadd.f32 1.0, %v663_v27 }
 0x103   : > { %664 = vrcp.f32 %v434_v28 }
 0x10d   : > { %v665_v31 = vpop.eup %664 }
 0x10e   : > { %v443_v32 = vmul.f32 %v665_v31, %v441_v29 }
 0x110   : > { %v445_v33 = vmul.f32 %v444_v30, %v443_v32 }
 0x112   : > { %v446_v34 = vadd.f32 %v445_v33, %v273_v16 }
 0x114   : > { %447 = vst.msk [vmem:[%s254_s6] sm:$0xff] %vm284_vm1, %v446_v34 }
 0x115   : > { %679 = shalt.err (!%p676_p3)
}
 0x116   : > { %s680_s15 = scalar_lea.hbm %s858_s10, 128  ;;  %s684_s23 = scalar_lea.hbm %s906_s5, 256 }
 0x117   : > { %p681_p4 = scmp.ne.s32.totalorder %s858_s10, %s680_s15  ;;  %p685_p9 = scmp.lt.u32.totalorder %s858_s10, %s906_s5 }
 0x118   : > { %p686_p10 = scmp.lt.u32.totalorder %s684_s23, %s680_s15  ;;  %p688_p12 = scmp.lt.u32.totalorder %s680_s15, %s858_s10 }
 0x119   : > { %p682_p7 = pnand %p681_p4, %p803_p5 }
 0x11a   : > { %p687_p11 = por %p686_p10, %p685_p9 }
 0x11b   : > { %p683_p8 = pneg %p682_p7 }
 0x11c   : > { %p689_p13 = por %p688_p12, %p687_p11 }
 0x11e   : > { %p690_p0 = pnand %p689_p13, %p683_p8 }
 0x120   : > { %693 = shalt.err (!%p690_p0)
}
 0x121   : > { %618 = dma.vmem_to_hbm [thread:$0]  (%p803_p5), %s860_s7, 128, %s858_s10, %s449_s11  }
 0x122 PF: > { %p624_p1 = scmp.ge.s32.totalorder %s728_s21, 2  ;;  %s474_s30 = sand.u32 1, %s716_s18  }
 0x123   : > { %s475_s6 = scalar_lea.sflag [#allocation3], %s474_s30 }
 0x124   : > { %p621_p2 = pnand %p624_p1, %p807_p6 }
 0x126   : > { %711 = dma.done.wait (!%p621_p2), %s475_s6, 128  }
 0x127   : > { %713 = vsyncadd (!%p621_p2), %s475_s6, 4294967168  ;;  %p15_p3 = scmp.ge.s32.totalorder %s790_s24, 4   ;;  %s909_s18 = smov %s720_s19 }
 0x128   : > { %s910_s19 = smov %s724_s20  ;;  %s911_s20 = smov %s801_s27 }
 0x129   : > { %s912_s21 = smov %s790_s24  ;;  %17 = sbr.rel (!%p15_p3) target bundleno = 3 (0x3), region = 84 }
 0x130   :  { %480 = vsyncpa [#allocation3], 1 }
 0x131   :  { %482 = vsyncpa [#allocation3 + $0x1], 1 }

</bundles_post_ra>
